<compile_context>
chip_gen: v7x
topology: tpu7x:2x2x1
jax: 0.10.0
libtpu: 0.0.40
codegen_flags: <defaults>
</compile_context>

<pallas_src>
import functools

import jax
import jax.numpy as jnp
from jax.experimental import pallas as pl
from jax.experimental.pallas import tpu as pltpu

LANES = 128
MAX_BLOCK_ROWS = 8192  # (8192, 128) f32 = 4 MiB per input per pipeline buffer


def _round_up(x, m):
    return ((x + m - 1) // m) * m


def _bce_blur_kernel(pred_ref, true_ref, out_ref, *,
                     inv_alpha, block_rows, k_split, valid_elems):
    i = pl.program_id(0)

    x = pred_ref[...].astype(jnp.float32)
    z = true_ref[...].astype(jnp.float32)

    # e = exp(-|x|), reused for both the stable BCE and the sigmoid.
    e = jnp.exp(-jnp.abs(x))
    one_plus_e = 1.0 + e
    # BCEWithLogits (reduction='none'): max(x, 0) - x*z + log(1 + exp(-|x|))
    bce = jnp.maximum(x, 0.0) - x * z + jnp.log(one_plus_e)
    # sigmoid(x) = 1/(1+e) for x >= 0, e/(1+e) for x < 0
    r = 1.0 / one_plus_e
    p = jnp.where(x >= 0.0, r, e * r)

    dx = p - z
    alpha_factor = 1.0 - jnp.exp((dx - 1.0) * inv_alpha)
    loss = bce * alpha_factor

    def partial_sum(v):
        # Fold sublane-tile-wise to an (8, 128) slab.  The reshapes keep the
        # (8, 128) tile as the trailing dims (free); k_split > 1 breaks the
        # long dependent VPU add chain into interleaved accumulators.
        if k_split > 1:
            v4 = v.reshape(block_rows // (8 * k_split), k_split, 8, LANES)
            return jnp.sum(jnp.sum(v4, axis=0), axis=0)
        return jnp.sum(v.reshape(block_rows // 8, 8, LANES), axis=0)

    out_ref[...] = partial_sum(loss)

    if valid_elems is not None:
        # Only the LAST block can extend past the real data (OOB rows are
        # undefined, padded elements produce nonzero loss) -> re-write its
        # partial with an element-granularity mask.  Full blocks pay nothing.
        @pl.when(i == pl.num_programs(0) - 1)
        def _():
            row = jax.lax.broadcasted_iota(jnp.int32, loss.shape, 0)
            lane = jax.lax.broadcasted_iota(jnp.int32, loss.shape, 1)
            # int32 element index: fine for n < 2**31 elements.
            elem = (i * block_rows + row) * LANES + lane
            masked = jnp.where(elem < valid_elems, loss, 0.0)
            out_ref[...] = partial_sum(masked)


def _sublane_align(dtype):
    # Sub-32-bit dtypes pack along sublanes: (8,128) f32, (16,128) bf16,
    # (32,128) int8 tiles.
    return {4: 8, 2: 16, 1: 32}.get(jnp.dtype(dtype).itemsize, 8)


def bce_blur_with_logits_loss(pred, true, alpha=0.05):
    """Pallas TPU implementation of BCEBlurWithLogitsLoss.forward (scalar mean)."""
    assert pred.shape == true.shape
    n = int(pred.size)
    if n == 0:
        return jnp.float32(jnp.nan)  # mean over empty tensor, like torch
    inv_alpha = 1.0 / (float(alpha) + 0.0001)

    def prep(a):
        if jnp.issubdtype(a.dtype, jnp.bool_):
            a = a.astype(jnp.int8)  # keep bytes/elem minimal; kernel upcasts
        return a.reshape(-1)

    flat_p = prep(pred)
    flat_t = prep(true)

    rows = pl.cdiv(n, LANES)  # lane rows needed; last one may be partial

    if n % LANES != 0:
        # TODO(synk): a sub-128 tail forces one padded copy of each input;
        # fully zero-copy handling would need 1-D blocks / manual DMA.
        # Callers should prefer 128-multiple element counts (typical for
        # YOLO objectness maps).
        pad = rows * LANES - n
        flat_p = jnp.pad(flat_p, (0, pad))
        flat_t = jnp.pad(flat_t, (0, pad))

    p2d = flat_p.reshape(rows, LANES)
    t2d = flat_t.reshape(rows, LANES)

    alignment = max(_sublane_align(p2d.dtype), _sublane_align(t2d.dtype))

    # Block-size policy:
    #   * small inputs (rows <= 512): one block, overhead negligible.
    #   * mid-sized inputs: aim for >= 4 blocks so the "parallel" grid axis
    #     can shard across both v7x TensorCores (no-op on v5e/v6e).
    #   * large inputs: max-size blocks (amortize per-step overhead).
    if rows <= 512:
        target = rows
    elif rows >= 4 * MAX_BLOCK_ROWS:
        target = MAX_BLOCK_ROWS
    else:
        target = pl.cdiv(rows, 4)
    block_rows = min(MAX_BLOCK_ROWS, _round_up(max(target, 1), alignment))
    num_blocks = pl.cdiv(rows, block_rows)

    # Mask (last block only) whenever the gridded extent exceeds n elements:
    # covers both a ragged last row-block and sub-128 padding.
    valid_elems = n if num_blocks * block_rows * LANES != n else None

    sub_tiles = block_rows // 8
    k_split = 4 if sub_tiles % 4 == 0 else (2 if sub_tiles % 2 == 0 else 1)

    kernel = functools.partial(
        _bce_blur_kernel,
        inv_alpha=inv_alpha,
        block_rows=block_rows,
        k_split=k_split,
        valid_elems=valid_elems,
    )

    bytes_in = (p2d.size * p2d.dtype.itemsize) + (t2d.size * t2d.dtype.itemsize)
    cost = pl.CostEstimate(
        flops=15 * n,
        transcendentals=3 * n,  # exp(-|x|), log(1+e), exp(alpha term)
        bytes_accessed=bytes_in + num_blocks * 8 * LANES * 4,
    )

    partials = pl.pallas_call(
        kernel,
        out_shape=jax.ShapeDtypeStruct((num_blocks * 8, LANES), jnp.float32),
        grid_spec=pltpu.PrefetchScalarGridSpec(
            num_scalar_prefetch=0,
            grid=(num_blocks,),
            in_specs=[
                pl.BlockSpec((block_rows, LANES), lambda i: (i, 0)),
                pl.BlockSpec((block_rows, LANES), lambda i: (i, 0)),
            ],
            out_specs=pl.BlockSpec((8, LANES), lambda i: (i, 0)),
        ),
        compiler_params=pltpu.CompilerParams(
            # Independent per-block partial outputs -> safe to shard the grid
            # across TensorCores (v7x megacore); no serial accumulator.
            dimension_semantics=("parallel",),
            vmem_limit_bytes=32 * 1024 * 1024,
        ),
        cost_estimate=cost,
    )(p2d, t2d)

    return jnp.sum(partials) / jnp.float32(n)


def _reference(pred, true, alpha=0.05):
    # Pure-JAX reference mirroring the PyTorch module.
    x = pred.astype(jnp.float32)
    z = true.astype(jnp.float32)
    loss = jnp.maximum(x, 0.0) - x * z + jnp.log1p(jnp.exp(-jnp.abs(x)))
    p = jax.nn.sigmoid(x)
    dx = p - z
    alpha_factor = 1.0 - jnp.exp((dx - 1.0) / (alpha + 0.0001))
    return jnp.mean(loss * alpha_factor)


if __name__ == "__main__":
    key = jax.random.PRNGKey(0)
    k1, k2 = jax.random.split(key)
    # NCHW-shaped logits / targets, as in typical YOLO objectness maps.
    pred = jax.random.normal(k1, (2, 4, 16, 16), dtype=jnp.float32)
    true = (jax.random.uniform(k2, (2, 4, 16, 16)) > 0.5).astype(jnp.float32)

    out = bce_blur_with_logits_loss(pred, true, alpha=0.05)
    out = jax.block_until_ready(out)

    ref = _reference(pred, true, alpha=0.05)
    assert jnp.allclose(out, ref, atol=1e-5, rtol=1e-5), (out, ref)

    # Quick extra checks: bf16 inputs (no wrapper upcast) and a ragged size.
    pb = jax.random.normal(k1, (3, 5, 7, 11), dtype=jnp.float32)
    tb = (jax.random.uniform(k2, (3, 5, 7, 11)) > 0.5).astype(jnp.float32)
    out2 = jax.block_until_ready(
        bce_blur_with_logits_loss(pb.astype(jnp.bfloat16), tb, alpha=0.05))
    ref2 = _reference(pb.astype(jnp.bfloat16).astype(jnp.float32), tb, alpha=0.05)
    assert jnp.allclose(out2, ref2, atol=2e-3, rtol=2e-3), (out2, ref2)

    print("KERNEL_OK")
</pallas_src>

<mosaic_0001>
module attributes {stable_mosaic.version = 11 : i64} {
  func.func @_bce_blur_kernel(%arg0: i32, %arg1: memref<16x128xf32, #tpu.memory_space<vmem>>, %arg2: memref<16x128xf32, #tpu.memory_space<vmem>>, %arg3: memref<8x128xf32, #tpu.memory_space<vmem>>) attributes {dimension_semantics = [#tpu.dimension_semantics<parallel>], iteration_bounds = array<i64: 1>, scalar_prefetch = 0 : i64, scratch_operands = 0 : i64, tpu.core_type = #tpu.core_type<tc>, window_params = [{transform_indices = @transform_0, window_bounds = array<i64: 16, 128>}, {transform_indices = @transform_1, window_bounds = array<i64: 16, 128>}, {transform_indices = @transform_2, window_bounds = array<i64: 8, 128>}]} {
    %c0 = arith.constant 0 : index
    %c0_0 = arith.constant 0 : index
    %0 = vector.load %arg1[%c0, %c0_0] : memref<16x128xf32, #tpu.memory_space<vmem>>, vector<16x128xf32>
    %c0_1 = arith.constant 0 : index
    %c0_2 = arith.constant 0 : index
    %1 = vector.load %arg2[%c0_1, %c0_2] : memref<16x128xf32, #tpu.memory_space<vmem>>, vector<16x128xf32>
    %2 = math.absf %0 : vector<16x128xf32>
    %cst = arith.constant 0.000000e+00 : f32
    %3 = vector.broadcast %cst : f32 to vector<16x128xf32>
    %4 = arith.subf %3, %2 : vector<16x128xf32>
    %5 = math.exp %4 : vector<16x128xf32>
    %cst_3 = arith.constant 1.000000e+00 : f32
    %6 = vector.broadcast %cst_3 : f32 to vector<16x128xf32>
    %7 = arith.addf %6, %5 : vector<16x128xf32>
    %cst_4 = arith.constant 0.000000e+00 : f32
    %8 = vector.broadcast %cst_4 : f32 to vector<16x128xf32>
    %9 = arith.maximumf %0, %8 : vector<16x128xf32>
    %10 = arith.mulf %0, %1 : vector<16x128xf32>
    %11 = arith.subf %9, %10 : vector<16x128xf32>
    %12 = math.log %7 : vector<16x128xf32>
    %13 = arith.addf %11, %12 : vector<16x128xf32>
    %cst_5 = arith.constant 1.000000e+00 : f32
    %14 = vector.broadcast %cst_5 : f32 to vector<16x128xf32>
    %15 = arith.divf %14, %7 : vector<16x128xf32>
    %cst_6 = arith.constant 0.000000e+00 : f32
    %16 = vector.broadcast %cst_6 : f32 to vector<16x128xf32>
    %17 = arith.cmpf oge, %0, %16 : vector<16x128xf32>
    %18 = arith.mulf %5, %15 : vector<16x128xf32>
    %19 = arith.select %17, %15, %18 : vector<16x128xi1>, vector<16x128xf32>
    %20 = arith.subf %19, %1 : vector<16x128xf32>
    %cst_7 = arith.constant 1.000000e+00 : f32
    %21 = vector.broadcast %cst_7 : f32 to vector<16x128xf32>
    %22 = arith.subf %20, %21 : vector<16x128xf32>
    %cst_8 = arith.constant 19.9600792 : f32
    %23 = vector.broadcast %cst_8 : f32 to vector<16x128xf32>
    %24 = arith.mulf %22, %23 : vector<16x128xf32>
    %25 = math.exp %24 : vector<16x128xf32>
    %cst_9 = arith.constant 1.000000e+00 : f32
    %26 = vector.broadcast %cst_9 : f32 to vector<16x128xf32>
    %27 = arith.subf %26, %25 : vector<16x128xf32>
    %28 = arith.mulf %13, %27 : vector<16x128xf32>
    %29 = vector.shape_cast %28 : vector<16x128xf32> to vector<1x2x8x128xf32>
    %cst_10 = arith.constant dense<0.000000e+00> : vector<2x8x128xf32>
    %30 = vector.multi_reduction <add>, %29, %cst_10 [0] : vector<1x2x8x128xf32> to vector<2x8x128xf32>
    %cst_11 = arith.constant dense<0.000000e+00> : vector<8x128xf32>
    %31 = vector.multi_reduction <add>, %30, %cst_11 [0] : vector<2x8x128xf32> to vector<8x128xf32>
    %c0_12 = arith.constant 0 : index
    %c0_13 = arith.constant 0 : index
    %32 = vector.load %arg3[%c0_12, %c0_13] : memref<8x128xf32, #tpu.memory_space<vmem>>, vector<8x128xf32>
    tpu.vector_store %arg3[%c0_12, %c0_13], %31 {strides = array<i32>} : memref<8x128xf32, #tpu.memory_space<vmem>>, vector<8x128xf32>,
    return
  }
  func.func @transform_0(%arg0: i32) -> (i32, i32) {
    %c0_i32 = arith.constant 0 : i32
    %c0_i32_0 = arith.constant 0 : i32
    return %arg0, %c0_i32 : i32, i32
  }
  func.func @transform_1(%arg0: i32) -> (i32, i32) {
    %c0_i32 = arith.constant 0 : i32
    %c0_i32_0 = arith.constant 0 : i32
    return %arg0, %c0_i32 : i32, i32
  }
  func.func @transform_2(%arg0: i32) -> (i32, i32) {
    %c0_i32 = arith.constant 0 : i32
    %c0_i32_0 = arith.constant 0 : i32
    return %arg0, %c0_i32 : i32, i32
  }
}

</mosaic_0001>

<bundles_post_ra>
// kernel: tpu_custom_call.1
= control target key start
LH: loop header
LB: loop body
LE: loop exit
PB: predicated region body
PF: predicated region fallthrough
CT: control target
= control target key end

     0   :  { %7 = vsyncpa [#allocation3], 0  ;;  %s261_s0 = inlined_call_operand.hbm [shape: f32[16,128], index: 0, kind: input, shape index: {}]   ;;  %s262_s1 = inlined_call_operand.hbm [shape: f32[16,128], index: 1, kind: input, shape index: {}]   ;;  %s263_s2 = inlined_call_operand.hbm [shape: f32[8,128], index: 2, kind: output, shape index: {}]  }
   0x1   :  { %8 = vsyncpa [#allocation6], 0 }
   0x2   :  { %9 = vsyncpa [#allocation4], 0  ;;  %s205_s9 = smov [#allocation2]   ;;  %s133_s13 = scalar_lea.hbm %s261_s0, 256 }
   0x3   :  { %s15_s10 = sshll.u32 %s205_s9, 4  ;;  %p134_p0 = scmp.ne.s32.totalorder %s261_s0, %s133_s13  ;;  %s16_s10 = int_to_ptr.vmem [resolvable:$true] %s15_s10 }
   0x4   :  { %p137_p1 = scmp.lt.u32.totalorder %s133_s13, %s261_s0 }
   0x6   :  { %p139_p2 = pnand %p137_p1, %p134_p0 }
   0x8   :  { %142 = shalt.err (!%p139_p2)
}
   0x9   :  { %s143_s18 = scalar_lea.vmem %s16_s10, 256  ;;  %p148_p4 = scmp.lt.s32.totalorder %s16_s10, %s16_s10 }
   0xa   :  { %p144_p3 = scmp.ne.s32.totalorder %s16_s10, %s143_s18  ;;  %p149_p5 = scmp.lt.s32.totalorder %s143_s18, %s143_s18 }
   0xc   :  { %p150_p6 = por %p149_p5, %p148_p4 }
   0xe   :  { %p151_p7 = pnand %p150_p6, %p144_p3 }
  0x10   :  { %154 = shalt.err (!%p151_p7)
}
  0x11   :  { %s206_s19 = smov 128   ;;  %s207_s20 = smov 8  }
  0x12   :  { %21 = dma.hbm_to_vmem [thread:$0]  %s261_s0, 256, %s16_s10, [#allocation3], %s206_s19, %s206_s19, %s207_s20  }
  0x13   :  { %s208_s23 = smov [#allocation5]   ;;  %s155_s27 = scalar_lea.hbm %s262_s1, 256 }
  0x14   :  { %s27_s24 = sshll.u32 %s208_s23, 4  ;;  %p156_p8 = scmp.ne.s32.totalorder %s262_s1, %s155_s27  ;;  %s28_s24 = int_to_ptr.vmem [resolvable:$true] %s27_s24 }
  0x15   :  { %p159_p9 = scmp.lt.u32.totalorder %s155_s27, %s262_s1 }
  0x17   :  { %p161_p10 = pnand %p159_p9, %p156_p8 }
  0x19   :  { %164 = shalt.err (!%p161_p10)
}
  0x1a   :  { %s165_s4 = scalar_lea.vmem %s28_s24, 256  ;;  %p170_p12 = scmp.lt.s32.totalorder %s28_s24, %s28_s24 }
  0x1b   :  { %p166_p11 = scmp.ne.s32.totalorder %s28_s24, %s165_s4  ;;  %p171_p13 = scmp.lt.s32.totalorder %s165_s4, %s165_s4 }
  0x1d   :  { %p172_p0 = por %p171_p13, %p170_p12 }
  0x1f   :  { %p173_p1 = pnand %p172_p0, %p166_p11 }
  0x21   :  { %176 = shalt.err (!%p173_p1)
}
  0x22   :  { %33 = dma.hbm_to_vmem [thread:$0]  %s262_s1, 256, %s28_s24, [#allocation6], %s206_s19, %s206_s19, %s207_s20  }
  0x23   :  { %199 = dma.done.wait [#allocation3], 256  }
  0x24   :  { %200 = vsyncadd [#allocation3], 4294967040 }
  0x25   :  { %201 = dma.done.wait [#allocation6], 256  }
  0x26   :  { %202 = vsyncadd [#allocation6], 4294967040  ;;  %v40_v0 = vld [vmem:[#allocation2] sm:$0xff]  ;;  %v41_v1 = vld [vmem:[#allocation2 + $0x8] sm:$0xff]  ;;  %s209_s1 = smov [#allocation7]  }
  0x27   :  { %v44_v2 = vand.u32 2147483647, %v40_v0  ;;  %v45_v3 = vand.u32 2147483647, %v41_v1  ;;  %vm70_vm0 = vcmp.ge.f32.partialorder %v40_v0, 0.0  ;;  %v42_v14 = vld [vmem:[#allocation5] sm:$0xff] }
  0x28   :  { %vm71_vm1 = vcmp.ge.f32.partialorder %v41_v1, 0.0  ;;  %v43_v16 = vld [vmem:[#allocation5 + $0x8] sm:$0xff]  ;;  %v54_v28 = vmax.f32 %v40_v0, 0.0  ;;  %v56_v29 = vmul.f32 %v42_v14, %v40_v0  ;;  %v55_v31 = vmax.f32 %v41_v1, 0.0  ;;  %s100_s6 = sshll.u32 %s209_s1, 4  ;;  %s101_s6 = int_to_ptr.vmem [resolvable:$true] %s100_s6 }
  0x29   :  { %v46_v4 = vsub.f32 0.0, %v44_v2  ;;  %v47_v5 = vsub.f32 0.0, %v45_v3  ;;  %v57_v32 = vmul.f32 %v43_v16, %v41_v1  ;;  %s177_s7 = scalar_lea.vmem %s101_s6, 128  ;;  %p182_p3 = scmp.lt.s32.totalorder %s101_s6, %s101_s6 }
  0x2a   :  { %v58_v34 = vsub.f32 %v54_v28, %v56_v29  ;;  %p178_p2 = scmp.ne.s32.totalorder %s101_s6, %s177_s7  ;;  %p183_p4 = scmp.lt.s32.totalorder %s177_s7, %s177_s7 }
  0x2b   :  { %v48_v6 = vmul.f32 1.442695, %v46_v4  ;;  %v50_v7 = vmul.f32 1.442695, %v47_v5  ;;  %v59_v36 = vsub.f32 %v55_v31, %v57_v32 }
  0x2c   :  { %p184_p5 = por %p183_p4, %p182_p3 }
  0x2d   :  { %117 = vpow2.f32 %v48_v6 }
  0x2e   :  { %119 = vpow2.f32 %v50_v7  ;;  %p185_p6 = pnand %p184_p5, %p178_p2 }
  0x37   :  { %v118_v8 = vpop.eup %117 }
  0x38   :  { %v120_v9 = vpop.eup %119  ;;  %v52_v10 = vadd.f32 1.0, %v118_v8 }
  0x39   :  { %v53_v11 = vadd.f32 1.0, %v120_v9 }
  0x3a   :  { %121 = vrcp.f32 %v52_v10 }
  0x3b   :  { %123 = vrcp.f32 %v53_v11 }
  0x3c   :  { %125 = vlog2.f32 %v52_v10 }
  0x3d   :  { %127 = vlog2.f32 %v53_v11 }
  0x44   :  { %v122_v12 = vpop.eup %121 }
  0x45   :  { %v124_v13 = vpop.eup %123  ;;  %v72_v15 = vmul.f32 %v122_v12, %v118_v8 }
  0x46   :  { %v73_v17 = vmul.f32 %v124_v13, %v120_v9  ;;  %v126_v30 = vpop.eup %125 }
  0x47   :  { %v74_v18 = vsel %vm70_vm0, %v122_v12, %v72_v15  ;;  %v128_v33 = vpop.eup %127  ;;  %v61_v35 = vmul.f32 0.6931472, %v126_v30 }
  0x48   :  { %v75_v19 = vsel %vm71_vm1, %v124_v13, %v73_v17  ;;  %v76_v20 = vsub.f32 %v74_v18, %v42_v14  ;;  %v63_v37 = vmul.f32 0.6931472, %v128_v33 }
  0x49   :  { %v77_v21 = vsub.f32 %v75_v19, %v43_v16  ;;  %v64_v38 = vadd.f32 %v61_v35, %v58_v34 }
  0x4a   :  { %v110_v22 = vadd.f32 -1.0, %v76_v20  ;;  %v65_v40 = vadd.f32 %v63_v37, %v59_v36 }
  0x4b   :  { %v111_v23 = vadd.f32 -1.0, %v77_v21 }
  0x4c   :  { %v80_v24 = vmul.f32 19.96008, %v110_v22 }
  0x4d   :  { %v81_v25 = vmul.f32 19.96008, %v111_v23 }
  0x4e   :  { %v82_v26 = vmul.f32 1.442695, %v80_v24 }
  0x4f   :  { %v84_v27 = vmul.f32 1.442695, %v81_v25 }
  0x50   :  { %129 = vpow2.f32 %v82_v26 }
  0x51   :  { %131 = vpow2.f32 %v84_v27 }
  0x5a   :  { %v130_v39 = vpop.eup %129 }
  0x5b   :  { %v132_v41 = vpop.eup %131  ;;  %v86_v42 = vsub.f32 1.0, %v130_v39 }
  0x5c   :  { %v87_v43 = vsub.f32 1.0, %v132_v41 }
  0x5d   :  { %v88_v44 = vmul.f32 %v86_v42, %v64_v38 }
  0x5e   :  { %v89_v45 = vmul.f32 %v87_v43, %v65_v40 }
  0x60   :  { %v92_v46 = vadd.f32 %v89_v45, %v88_v44 }
  0x62   :  { %93 = vst [vmem:[#allocation7] sm:$0xff] %v92_v46 }
  0x63   :  { %188 = shalt.err (!%p185_p6)
}
  0x64   :  { %s189_s10 = scalar_lea.hbm %s263_s2, 128 }
  0x65   :  { %p190_p7 = scmp.ne.s32.totalorder %s263_s2, %s189_s10  ;;  %p193_p8 = scmp.lt.u32.totalorder %s189_s10, %s263_s2 }
  0x67   :  { %p195_p9 = pnand %p193_p8, %p190_p7 }
  0x69   :  { %198 = shalt.err (!%p195_p9)
}
  0x6a   :  { %103 = dma.vmem_to_hbm [thread:$0]  %s101_s6, 128, %s263_s2, [#allocation4]  }
  0x6b   :  { %203 = dma.done.wait [#allocation4], 128  }
  0x6c   :  { %204 = vsyncadd [#allocation4], 4294967168 }
  0x6d   :  { %107 = vsyncpa [#allocation3], 1 }
  0x6e   :  { %108 = vsyncpa [#allocation6], 1 }
  0x6f   :  { %109 = vsyncpa [#allocation4], 1 }

</bundles_post_ra>
